<compile_context>
chip_gen: v5e
topology: v5e:2x2
jax: 0.10.0
libtpu: 0.0.40
codegen_flags: <defaults>
</compile_context>

<pallas_src>
import jax
import jax.numpy as jnp
from jax.experimental import pallas as pl
from jax.experimental.pallas import tpu as pltpu

IN_DIM = 256
HID_DIM = 512
OUT_DIM = 40
OUT_PAD = 128  # output padded to one full lane group -> unmasked stores

_TM_LADDER = (2048, 1024, 512, 256, 128, 64, 32, 16, 8)


# ----------------------------------------------------------------------------
# Kernels
# ----------------------------------------------------------------------------
def fused_mlp_kernel(x_ref, w_ref, b_ref, o_ref):
    """Single matmul on precomposed weights: [tm,256] @ [256,128] + [1,128]."""
    x = x_ref[...].astype(jnp.bfloat16)  # no-op if caller already passes bf16
    y = jnp.dot(x, w_ref[...], preferred_element_type=jnp.float32)
    o_ref[...] = (y + b_ref[...]).astype(o_ref.dtype)


def twostage_mlp_kernel(x_ref, w1_ref, b1_ref, w2_ref, b2_ref, o_ref):
    """Two-stage path, kept for when an activation is inserted between layers."""
    x = x_ref[...].astype(jnp.bfloat16)
    h = jnp.dot(x, w1_ref[...], preferred_element_type=jnp.float32) + b1_ref[...]
    y = jnp.dot(h.astype(jnp.bfloat16), w2_ref[...],
                preferred_element_type=jnp.float32)
    o_ref[...] = (y + b2_ref[...]).astype(o_ref.dtype)


# ----------------------------------------------------------------------------
# Parameter init / one-time prep (hoisted out of the forward path)
# ----------------------------------------------------------------------------
def init_params(key):
    """Deterministic PyTorch-style uniform(-1/sqrt(fan_in), 1/sqrt(fan_in)) init.
    Weights are stored pre-transposed as [in, out]."""
    k1, k2, k3, k4 = jax.random.split(key, 4)
    bound1 = 1.0 / jnp.sqrt(jnp.float32(IN_DIM))
    bound2 = 1.0 / jnp.sqrt(jnp.float32(HID_DIM))
    w1_t = jax.random.uniform(k1, (IN_DIM, HID_DIM), jnp.float32, -bound1, bound1)
    b1 = jax.random.uniform(k2, (1, HID_DIM), jnp.float32, -bound1, bound1)
    w2_t = jax.random.uniform(k3, (HID_DIM, OUT_DIM), jnp.float32, -bound2, bound2)
    b2 = jax.random.uniform(k4, (1, OUT_DIM), jnp.float32, -bound2, bound2)
    return w1_t, b1, w2_t, b2


def prepare_params(w1_t, b1, w2_t, b2):
    """One-time weight prep.

    Fused path (valid because the module has no activation between Linears):
        W = W1^T @ W2^T  composed in f32 at HIGHEST precision, zero-padded to
        128 output lanes and cast to bf16;  b = b1 @ W2^T + b2, padded, f32.
    Two-stage path: bf16 W1^T, f32 b1, padded bf16 W2^T, padded f32 b2.
    """
    hp = jax.lax.Precision.HIGHEST
    pad = OUT_PAD - OUT_DIM
    w_fused = jnp.dot(w1_t, w2_t, precision=hp)                  # [256, 40] f32
    b_fused = jnp.dot(b1, w2_t, precision=hp) + b2               # [1, 40]  f32
    return {
        "w_fused": jnp.pad(w_fused, ((0, 0), (0, pad))).astype(jnp.bfloat16),
        "b_fused": jnp.pad(b_fused, ((0, 0), (0, pad))).astype(jnp.float32),
        "w1": w1_t.astype(jnp.bfloat16),
        "b1": b1.astype(jnp.float32),
        "w2": jnp.pad(w2_t, ((0, 0), (0, pad))).astype(jnp.bfloat16),
        "b2": jnp.pad(b2, ((0, 0), (0, pad))).astype(jnp.float32),
    }


# ----------------------------------------------------------------------------
# Forward
# ----------------------------------------------------------------------------
def _pick_tm(B):
    """Largest batch tile that divides B with an EVEN step count >= 4
    (>=2 pipelined steps per v7x TensorCore); graceful fallback for small B."""
    for t in _TM_LADDER:
        if B % t == 0 and (B // t) >= 4 and (B // t) % 2 == 0:
            return t
    for t in _TM_LADDER:
        if B % t == 0 and (B // t) >= 2:
            return t
    return B  # tiny batch: one tile covering the whole (full-dim) block


def mlp_forward(x, params, *, tm=None, out_dtype=None, fused=True, unpad=True):
    """Forward of MLP(Linear(256,512) -> Linear(512,40)).

    fused=True  : single matmul on precomposed weights (default; exact same
                  function since the module has no intermediate activation).
    unpad=False : return the padded [B, 128] buffer (tail columns are exactly
                  zero) and skip the extra XLA slice pass.
    """
    B = x.shape[0]
    assert x.shape[1] == IN_DIM
    if tm is None:
        tm = _pick_tm(B)
    assert B % tm == 0, "batch must be divisible by tile size"
    assert tm % 8 == 0 or tm == B, "x tile needs an 8-sublane multiple"
    grid = (B // tm,)
    out_dtype = x.dtype if out_dtype is None else out_dtype
    out_itemsize = jnp.dtype(out_dtype).itemsize

    const = lambda i: (0, 0)
    x_spec = pl.BlockSpec((tm, IN_DIM), lambda i: (i, 0))
    o_spec = pl.BlockSpec((tm, OUT_PAD), lambda i: (i, 0))

    if fused:
        kernel = fused_mlp_kernel
        operands = (x, params["w_fused"], params["b_fused"])
        in_specs = [
            x_spec,
            pl.BlockSpec((IN_DIM, OUT_PAD), const),   # composed W (bf16, resident)
            pl.BlockSpec((1, OUT_PAD), const),        # composed b (f32)
        ]
        flops = 2 * B * IN_DIM * OUT_PAD
        bytes_accessed = (x.size * x.dtype.itemsize
                          + params["w_fused"].size * 2
                          + params["b_fused"].size * 4
                          + B * OUT_PAD * out_itemsize)
    else:
        kernel = twostage_mlp_kernel
        operands = (x, params["w1"], params["b1"], params["w2"], params["b2"])
        in_specs = [
            x_spec,
            pl.BlockSpec((IN_DIM, HID_DIM), const),   # W1^T (bf16, resident)
            pl.BlockSpec((1, HID_DIM), const),        # b1
            pl.BlockSpec((HID_DIM, OUT_PAD), const),  # W2^T padded (bf16)
            pl.BlockSpec((1, OUT_PAD), const),        # b2 padded
        ]
        flops = 2 * B * (IN_DIM * HID_DIM + HID_DIM * OUT_PAD)
        bytes_accessed = (x.size * x.dtype.itemsize
                          + params["w1"].size * 2 + params["w2"].size * 2
                          + params["b1"].size * 4 + params["b2"].size * 4
                          + B * OUT_PAD * out_itemsize)

    out_padded = pl.pallas_call(
        kernel,
        out_shape=jax.ShapeDtypeStruct((B, OUT_PAD), out_dtype),
        grid_spec=pltpu.PrefetchScalarGridSpec(
            num_scalar_prefetch=0,
            grid=grid,
            in_specs=in_specs,
            out_specs=o_spec,
        ),
        compiler_params=pltpu.CompilerParams(
            dimension_semantics=("parallel",),
        ),
        cost_estimate=pl.CostEstimate(
            flops=flops, transcendentals=0, bytes_accessed=bytes_accessed),
    )(*operands)

    if unpad:
        return out_padded[:, :OUT_DIM]
    return out_padded


# ----------------------------------------------------------------------------
# Self-test
# ----------------------------------------------------------------------------
if __name__ == "__main__":
    key = jax.random.PRNGKey(0)
    k_x, k_p = jax.random.split(key)

    # Small batch that still exercises the grid: _pick_tm -> tm=64, 4 even steps.
    B = 256
    x = jax.random.normal(k_x, (B, IN_DIM), jnp.float32)
    raw = init_params(k_p)
    params = prepare_params(*raw)  # one-time prep, not per forward call

    # Fused (precomposed) path, padded output -> no wrapper slice pass.
    out_pad = jax.block_until_ready(mlp_forward(x, params, unpad=False))
    assert out_pad.shape == (B, OUT_PAD)
    out = out_pad[:, :OUT_DIM]

    # Two-stage path (retained for a variant with an activation between layers).
    out2 = jax.block_until_ready(mlp_forward(x, params, fused=False))
    assert out2.shape == (B, OUT_DIM)

    # Pure-JAX f32 reference of the module's forward (Linear -> Linear, no
    # nonlinearity, matching the PyTorch module).  Relaxed tolerance: bf16 MXU
    # operands with f32 accumulation.
    w1_t, b1, w2_t, b2 = raw
    hp = jax.lax.Precision.HIGHEST
    ref = jnp.dot(jnp.dot(x, w1_t, precision=hp) + b1, w2_t, precision=hp) + b2

    assert jnp.allclose(out, ref, atol=5e-2, rtol=5e-2)
    assert jnp.allclose(out2, ref, atol=5e-2, rtol=5e-2)
    # Padded tail lanes carry exactly zero (zero-padded weights and bias).
    assert jnp.all(out_pad[:, OUT_DIM:] == 0)

    print("KERNEL_OK")
</pallas_src>

<mosaic_0001>
module attributes {stable_mosaic.version = 11 : i64} {
  func.func @fused_mlp_kernel(%arg0: i32, %arg1: memref<64x256xf32, #tpu.memory_space<vmem>>, %arg2: memref<256x128xbf16, #tpu.memory_space<vmem>>, %arg3: memref<1x128xf32, #tpu.memory_space<vmem>>, %arg4: memref<64x128xf32, #tpu.memory_space<vmem>>) attributes {dimension_semantics = [#tpu.dimension_semantics<parallel>], iteration_bounds = array<i64: 4>, scalar_prefetch = 0 : i64, scratch_operands = 0 : i64, tpu.core_type = #tpu.core_type<tc>, window_params = [{transform_indices = @transform_0, window_bounds = array<i64: 64, 256>}, {pipeline_mode = #tpu.pipeline_mode<synchronous>, transform_indices = @transform_1, window_bounds = array<i64: 256, 128>}, {pipeline_mode = #tpu.pipeline_mode<synchronous>, transform_indices = @transform_2, window_bounds = array<i64: 1, 128>}, {transform_indices = @transform_3, window_bounds = array<i64: 64, 128>}]} {
    %c0 = arith.constant 0 : index
    %c0_0 = arith.constant 0 : index
    %0 = vector.load %arg1[%c0, %c0_0] : memref<64x256xf32, #tpu.memory_space<vmem>>, vector<64x256xf32>
    %1 = arith.truncf %0 : vector<64x256xf32> to vector<64x256xbf16>
    %c0_1 = arith.constant 0 : index
    %c0_2 = arith.constant 0 : index
    %2 = vector.load %arg2[%c0_1, %c0_2] : memref<256x128xbf16, #tpu.memory_space<vmem>>, vector<256x128xbf16>
    %cst = arith.constant dense<0.000000e+00> : vector<64x128xf32>
    %3 = tpu.matmul %1, %2, %cst {dimension_numbers = #tpu.dot_dimension_numbers<[1], [0], [0], [1], [0, 0, 1, 1], [], []>} : vector<64x256xbf16>, vector<256x128xbf16>, vector<64x128xf32> -> vector<64x128xf32>
    %c0_3 = arith.constant 0 : index
    %c0_4 = arith.constant 0 : index
    %4 = vector.load %arg3[%c0_3, %c0_4] : memref<1x128xf32, #tpu.memory_space<vmem>>, vector<1x128xf32>
    %5 = vector.broadcast %4 : vector<1x128xf32> to vector<64x128xf32>
    %6 = arith.addf %3, %5 : vector<64x128xf32>
    %c0_5 = arith.constant 0 : index
    %c0_6 = arith.constant 0 : index
    %7 = vector.load %arg4[%c0_5, %c0_6] : memref<64x128xf32, #tpu.memory_space<vmem>>, vector<64x128xf32>
    tpu.vector_store %arg4[%c0_5, %c0_6], %6 {strides = array<i32>} : memref<64x128xf32, #tpu.memory_space<vmem>>, vector<64x128xf32>,
    return
  }
  func.func @transform_0(%arg0: i32) -> (i32, i32) {
    %c0_i32 = arith.constant 0 : i32
    %c0_i32_0 = arith.constant 0 : i32
    return %arg0, %c0_i32 : i32, i32
  }
  func.func @transform_1(%arg0: i32) -> (i32, i32) {
    %c0_i32 = arith.constant 0 : i32
    %c0_i32_0 = arith.constant 0 : i32
    %c0_i32_1 = arith.constant 0 : i32
    return %c0_i32, %c0_i32_0 : i32, i32
  }
  func.func @transform_2(%arg0: i32) -> (i32, i32) {
    %c0_i32 = arith.constant 0 : i32
    %c0_i32_0 = arith.constant 0 : i32
    %c0_i32_1 = arith.constant 0 : i32
    return %c0_i32, %c0_i32_0 : i32, i32
  }
  func.func @transform_3(%arg0: i32) -> (i32, i32) {
    %c0_i32 = arith.constant 0 : i32
    %c0_i32_0 = arith.constant 0 : i32
    return %arg0, %c0_i32 : i32, i32
  }
}

</mosaic_0001>

<bundles_post_ra>
// kernel: tpu_custom_call.1
= control target key start
LH: loop header
LB: loop body
LE: loop exit
PB: predicated region body
PF: predicated region fallthrough
CT: control target
= control target key end

     0   :  { %8 = vsyncpa [#allocation3], 0  ;;  %s1042_s0 = inlined_call_operand.hbm [shape: f32[256,256], index: 0, kind: input, shape index: {}]   ;;  %s1043_s1 = inlined_call_operand.hbm [shape: bf16[256,128], index: 1, kind: input, shape index: {}]   ;;  %s1044_s2 = inlined_call_operand.vmem [shape: f32[1,128], index: 2, kind: input, shape index: {}]   ;;  %s1045_s3 = inlined_call_operand.hbm [shape: f32[256,128], index: 3, kind: output, shape index: {}]  }
   0x1   :  { %10 = vsyncpa [#allocation3 + $0x1], 0 }
   0x2   :  { %11 = vsyncpa [#allocation6], 0 }
   0x3   :  { %12 = vsyncpa [#allocation4], 0 }
   0x4   :  { %14 = vsyncpa [#allocation4 + $0x1], 0  ;;  %s871_s12 = smov 0   ;;  %s873_s13 = smov 0  }
   0x5   :  { %s875_s14 = smov 0   ;;  %s877_s15 = smov 0  }
   0x6 LB: > { %s892_s16 = sadd.s32 4294967295, %s842_s15   ;;  %s532_s17 = sadd.s32 4294967294, %s842_s15   ;;  %s842_s15 = sphi %s877_s15, %s1054_s15   ;;  %s838_s14 = sphi %s875_s14, %s1053_s14   ;;  %s834_s13 = sphi %s873_s13, %s1052_s13   ;;  %s830_s12 = sphi %s871_s12, %s1051_s12  }
   0x7   : > { %p40_p0 = scmp.ne.s32.totalorder %s834_s13, %s830_s12  ;;  %p41_p1 = scmp.eq.s32.totalorder %s892_s16, 0 }
   0x8   : > { %p106_p2 = scmp.eq.s32.totalorder %s892_s16, 3  ;;  %p112_p3 = scmp.eq.s32.totalorder %s532_s17, 3 }
   0x9   : > { %p901_p4 = por %p41_p1, %p40_p0  ;;  %p533_p5 = scmp.ge.s32.totalorder %s842_s15, 1 }
   0xa   : > { %p906_p6 = por %p112_p3, %p40_p0  ;;  %p119_p7 = scmp.lt.s32.totalorder %s842_s15, 5 }
   0xb   : > { %s130_s22 = sshll.u32 %s1043_s1, 4  ;;  %s844_s24 = smov [#allocation5]   ;;  %s131_s22 = int_to_ptr.hbm [resolvable:$true] %s130_s22 }
   0xc   : > { %p914_p8 = pnand %p533_p5, %p119_p7  ;;  %s132_s25 = sshll.u32 %s844_s24, 4  ;;  %s133_s25 = int_to_ptr.vmem [resolvable:$true] %s132_s25 }
   0xd   : > { %s923_s26 = sadd.s32 1, %s842_s15   ;;  %s845_s27 = smov 64  }
   0xe   : > { %p656_p9 = pneg %p914_p8  ;;  %s846_s28 = smov 4  }
   0xf   : > { %s24_s29 = ssub.s32 %s842_s15, %s923_s26  ;;  %s27_s30 = sadd.s32 1, %s838_s14 }
  0x10   : > { %p657_p10 = pnand %p656_p9, %p41_p1  ;;  %p25_p11 = scmp.eq.s32.totalorder %s24_s29, 0 }
  0x11   : > { %p34_p12 = scmp.ne.s32.totalorder %s838_s14, %s834_s13  ;;  %p35_p13 = scmp.eq.s32.totalorder %s842_s15, 0 }
  0x12   : > { %659 = dma.hbm_to_vmem [thread:$0]  (!%p657_p10), %s131_s22, 2048, %s133_s25, [#allocation6], %s845_s27, %s845_s27, %s846_s28  }
  0x13   : > { %p669_p0 = scmp.lt.s32.totalorder %s842_s15, 4  ;;  %p36_p3 = por %p35_p13, %p34_p12 }
  0x14   : > { %s933_s4 = scalar_select %p25_p11, %s838_s14, %s27_s30  }
  0x15   : > { %p937_p5 = por %p106_p2, %p34_p12  ;;  %s149_s6 = sand.u32 1, %s838_s14  }
  0x16   : > { %s614_s7 = sshll.u32 %s842_s15, 7  ;;  %s536_s8 = sshll.u32 %s149_s6, 7 }
  0x17   : > { %s159_s11 = scalar_lea.hbm %s1042_s0, %s614_s7  ;;  %s153_s20 = scalar_lea.vmem [#allocation2], %s536_s8 }
  0x18   : > { %s160_s17 = sshll.u32 %s159_s11, 4  ;;  %s162_s21 = sshll.u32 %s153_s20, 4  ;;  %s161_s17 = int_to_ptr.hbm [resolvable:$true] %s160_s17  ;;  %s163_s21 = int_to_ptr.vmem [resolvable:$true] %s162_s21 }
  0x19   : > { %p948_p7 = pnand %p669_p0, %p36_p3  ;;  %s150_s24 = scalar_lea.sflag [#allocation3], %s149_s6 }
  0x1a   : > { %s742_s25 = sshra.s32 %s161_s17, 4  ;;  %s749_s30 = scalar_lea.hbm %s1042_s0, 512  ;;  %s743_s25 = int_to_ptr.hbm [resolvable:$true] %s742_s25 }
  0x1b   : > { %s744_s27 = scalar_lea.hbm %s743_s25, 128  ;;  %p746_p9 = pneg %p948_p7 }
  0x1c   : > { %p745_p2 = scmp.ne.s32.totalorder %s743_s25, %s744_s27  ;;  %p750_p12 = scmp.lt.s32.totalorder %s743_s25, %s1042_s0 }
  0x1d   : > { %p751_p13 = scmp.lt.s32.totalorder %s749_s30, %s744_s27 }
  0x1e   : > { %p747_p10 = pnand %p746_p9, %p745_p2 }
  0x1f   : > { %p752_p0 = por %p751_p13, %p750_p12 }
  0x20   : > { %p748_p11 = pneg %p747_p10 }
  0x22   : > { %p753_p3 = pnand %p752_p0, %p748_p11 }
  0x24   : > { %756 = shalt.err (!%p753_p3)
}
  0x25   : > { %s847_s6 = smov 256   ;;  %s848_s9 = smov 16  }
  0x26   : > { %663 = dma.hbm_to_vmem [thread:$0]  (!%p948_p7), %s161_s17, 2048, %s163_s21, %s150_s24, %s847_s6, %s847_s6, %s848_s9  }
  0x27   : > { %174 = sbr.rel (%p914_p8) target bundleno = 243 (0xf3), region = 32  ;;  %s965_s10 = sand.u32 (!%p914_p8), 1, %s834_s13  }
  0x28   : > { %s541_s11 = sshll.u32 (!%p914_p8), %s965_s10, 7  ;;  %s177_s20 = scalar_lea.sflag (!%p914_p8), [#allocation3], %s965_s10 }
  0x29   : > { %s969_s25 = scalar_lea.vmem (!%p914_p8), [#allocation2], %s541_s11 }
  0x2c   : > { %817 = dma.done.wait (%p901_p4), %s177_s20, 2048  }
  0x2d   : > { %819 = vsyncadd (%p901_p4), %s177_s20, 4294965248 }
  0x2e   : > { %821 = dma.done.wait (%p41_p1), [#allocation6], 2048  }
  0x2f   : > { %823 = vsyncadd (%p41_p1), [#allocation6], 4294965248  ;;  %v622_v0 = vld [vmem:[#allocation5 + $0x38] sm:$0xff]  ;;  %v621_v2 = vld [vmem:[#allocation5 + $0x30] sm:$0xff]  ;;  %s543_s17 = sshll.u32 %s965_s10, 6  ;;  %s631_s22 = sshll.u32 %s892_s16, 6 }
  0x30   : > { %v630_v1 = vld [vmem:[#allocation5 + $0x78] sm:$0xff]  ;;  %367 = vmatpush.bf16.msra.mxu0 %v622_v0  ;;  %632 = vmatpush.bf16.msra.mxu2 %v622_v0  ;;  %v629_v3 = vld [vmem:[#allocation5 + $0x70] sm:$0xff]  ;;  %v620_v4 = vld [vmem:[#allocation5 + $0x28] sm:$0xff]  ;;  %s999_s21 = scalar_lea.vmem [#allocation7], %s543_s17  ;;  %s445_s28 = scalar_lea.hbm %s1045_s3, %s631_s22 }
  0x31   : > { %396 = vmatpush.bf16.msra.mxu1 %v630_v1  ;;  %640 = vmatpush.bf16.msra.mxu3 %v630_v1  ;;  %v628_v5 = vld [vmem:[#allocation5 + $0x68] sm:$0xff]  ;;  %v619_v6 = vld [vmem:[#allocation5 + $0x20] sm:$0xff]  ;;  %v618_v8 = vld [vmem:[#allocation5 + $0x18] sm:$0xff]  ;;  %s446_s29 = sshll.u32 %s999_s21, 4  ;;  %s448_s30 = sshll.u32 %s445_s28, 4  ;;  %s447_s29 = int_to_ptr.vmem [resolvable:$true] %s446_s29  ;;  %s449_s30 = int_to_ptr.hbm [resolvable:$true] %s448_s30 }
  0x32   : > { %v627_v7 = vld [vmem:[#allocation5 + $0x60] sm:$0xff]  ;;  %v626_v9 = vld [vmem:[#allocation5 + $0x58] sm:$0xff]  ;;  %v617_v10 = vld [vmem:[#allocation5 + $0x10] sm:$0xff]  ;;  %s434_s16 = scalar_lea.sflag [#allocation4], %s965_s10  ;;  %s786_s7 = sshra.s32 %s449_s30, 4  ;;  %s787_s7 = int_to_ptr.hbm [resolvable:$true] %s786_s7 }
  0x33   : > { %v625_v11 = vld [vmem:[#allocation5 + $0x50] sm:$0xff]  ;;  %v616_v12 = vld [vmem:[#allocation5 + $0x8] sm:$0xff]  ;;  %v615_v14 = vld [vmem:[#allocation5] sm:$0xff]  ;;  %s788_s8 = scalar_lea.hbm %s787_s7, 64  ;;  %s792_s11 = scalar_lea.hbm %s1045_s3, 256 }
  0x34   : > { %368 = vmatpush.bf16.msra.mxu0 %v621_v2  ;;  %633 = vmatpush.bf16.msra.mxu2 %v621_v2  ;;  %v624_v13 = vld [vmem:[#allocation5 + $0x48] sm:$0xff]  ;;  %v623_v15 = vld [vmem:[#allocation5 + $0x40] sm:$0xff]  ;;  %v213_v17 = vld [vmem:[%s969_s25 + $0x10] sm:$0xff]  ;;  %p789_p1 = scmp.ne.s32.totalorder %s787_s7, %s788_s8  ;;  %p793_p7 = scmp.lt.s32.totalorder %s787_s7, %s1045_s3 }
  0x35   : > { %397 = vmatpush.bf16.msra.mxu1 %v629_v3  ;;  %641 = vmatpush.bf16.msra.mxu3 %v629_v3  ;;  %v211_v16 = vld [vmem:[%s969_s25] sm:$0xff]  ;;  %v221_v19 = vld [vmem:[%s969_s25 + $0x50] sm:$0xff]  ;;  %v212_v20 = vld [vmem:[%s969_s25 + $0x8] sm:$0xff]  ;;  %p794_p2 = scmp.lt.s32.totalorder %s792_s11, %s788_s8 }
  0x36   : > { %v219_v18 = vld [vmem:[%s969_s25 + $0x40] sm:$0xff]  ;;  %v214_v21 = vld [vmem:[%s969_s25 + $0x18] sm:$0xff]  ;;  %v220_v22 = vld [vmem:[%s969_s25 + $0x48] sm:$0xff]  ;;  %v227_v24 = vpack.c.bf16 %v213_v17, %v211_v16  ;;  %p790_p4 = pnand %p789_p1, %p937_p5 }
  0x37   : > { %v222_v23 = vld [vmem:[%s969_s25 + $0x58] sm:$0xff]  ;;  %v231_v25 = vpack.c.bf16 %v221_v19, %v219_v18  ;;  %v228_v26 = vpack.c.bf16 %v214_v21, %v212_v20  ;;  %v215_v28 = vld [vmem:[%s969_s25 + $0x20] sm:$0xff]  ;;  %v217_v29 = vld [vmem:[%s969_s25 + $0x30] sm:$0xff]  ;;  %p795_p9 = por %p794_p2, %p793_p7 }
  0x38   : > { %369 = vmatpush.bf16.msra.mxu0 %v620_v4  ;;  %634 = vmatpush.bf16.msra.mxu2 %v620_v4  ;;  %v232_v27 = vpack.c.bf16 %v222_v23, %v220_v22  ;;  %v223_v30 = vld [vmem:[%s969_s25 + $0x60] sm:$0xff]  ;;  %v225_v31 = vld [vmem:[%s969_s25 + $0x70] sm:$0xff]  ;;  %v216_v32 = vld [vmem:[%s969_s25 + $0x28] sm:$0xff]  ;;  %v229_v36 = vpack.c.bf16 %v217_v29, %v215_v28  ;;  %p791_p8 = pneg %p790_p4 }
  0x39   : > { %398 = vmatpush.bf16.msra.mxu1 %v628_v5  ;;  %642 = vmatpush.bf16.msra.mxu3 %v628_v5  ;;  %v218_v33 = vld [vmem:[%s969_s25 + $0x38] sm:$0xff]  ;;  %v224_v34 = vld [vmem:[%s969_s25 + $0x68] sm:$0xff]  ;;  %v233_v37 = vpack.c.bf16 %v225_v31, %v223_v30  ;;  %v711_v40 = vld [vmem:[%s1044_s2] ss:$0 sm:$0xff] }
  0x3a   : > { %v226_v35 = vld [vmem:[%s969_s25 + $0x78] sm:$0xff]  ;;  %v230_v38 = vpack.c.bf16 %v218_v33, %v216_v32  ;;  %p796_p10 = pnand %p795_p9, %p791_p8 }
  0x3b   : > { %v234_v39 = vpack.c.bf16 %v226_v35, %v224_v34 }
  0x3c   : > { %370 = vmatpush.bf16.msra.mxu0 %v619_v6  ;;  %635 = vmatpush.bf16.msra.mxu2 %v619_v6 }
  0x3d   : > { %399 = vmatpush.bf16.msra.mxu1 %v627_v7  ;;  %643 = vmatpush.bf16.msra.mxu3 %v627_v7 }
  0x40   : > { %371 = vmatpush.bf16.msra.mxu0 %v618_v8  ;;  %636 = vmatpush.bf16.msra.mxu2 %v618_v8 }
  0x41   : > { %400 = vmatpush.bf16.msra.mxu1 %v626_v9  ;;  %644 = vmatpush.bf16.msra.mxu3 %v626_v9 }
  0x44   : > { %372 = vmatpush.bf16.msra.mxu0 %v617_v10  ;;  %637 = vmatpush.bf16.msra.mxu2 %v617_v10 }
  0x45   : > { %401 = vmatpush.bf16.msra.mxu1 %v625_v11  ;;  %645 = vmatpush.bf16.msra.mxu3 %v625_v11 }
  0x48   : > { %373 = vmatpush.bf16.msra.mxu0 %v616_v12  ;;  %638 = vmatpush.bf16.msra.mxu2 %v616_v12 }
  0x49   : > { %402 = vmatpush.bf16.msra.mxu1 %v624_v13  ;;  %646 = vmatpush.bf16.msra.mxu3 %v624_v13 }
  0x4c   : > { %374 = vmatpush.bf16.msra.mxu0 %v615_v14  ;;  %639 = vmatpush.bf16.msra.mxu2 %v615_v14 }
  0x4d   : > { %403 = vmatpush.bf16.msra.mxu1 %v623_v15  ;;  %647 = vmatpush.bf16.msra.mxu3 %v623_v15 }
  0x4f   : > { %375 = vmatmul.bf16.vlgmr.msra.gmra.mxu0 %v227_v24  ;;  %385 = vmatmul.bf16.vlgmr.msra.gmra.mxu2 %v231_v25 }
  0x50   : > { %404 = vmatmul.bf16.vlgmr.msra.gmra.mxu1 %v228_v26  ;;  %414 = vmatmul.bf16.vlgmr.msra.gmra.mxu3 %v232_v27 }
  0x5f   : > { %380 = vmatmul.bf16.gmra.mxu0 %v229_v36  ;;  %390 = vmatmul.bf16.gmra.mxu2 %v233_v37 }
  0x60   : > { %409 = vmatmul.bf16.gmra.mxu1 %v230_v38  ;;  %419 = vmatmul.bf16.gmra.mxu3 %v234_v39 }
  0xcc   : > { %v376_v41 = vpop.f32.mrf.mxu0 }
  0xcd   : > { %v377_v42 = vadd.f32 %v711_v40, %v376_v41  ;;  %v405_v43 = vpop.f32.mrf.mxu1 }
  0xcf   : > { %v406_v44 = vadd.f32 %v405_v43, %v377_v42 }
  0xd1   : > { %425 = vst [vmem:[%s999_s21] sm:$0xff] %v406_v44 }
  0xd2   : > { %v386_v45 = vpop.f32.mrf.mxu2 }
  0xd3   : > { %v387_v46 = vadd.f32 %v711_v40, %v386_v45  ;;  %v415_v47 = vpop.f32.mrf.mxu3 }
  0xd4   : > { %v378_v48 = vpop.f32.mrf.mxu0 }
  0xd5   : > { %v416_v49 = vadd.f32 %v415_v47, %v387_v46  ;;  %v379_v50 = vadd.f32 %v711_v40, %v378_v48  ;;  %v407_v51 = vpop.f32.mrf.mxu1 }
  0xd7   : > { %429 = vst [vmem:[%s999_s21 + $0x20] sm:$0xff] %v416_v49  ;;  %v408_v52 = vadd.f32 %v407_v51, %v379_v50 }
  0xd9   : > { %426 = vst [vmem:[%s999_s21 + $0x8] sm:$0xff] %v408_v52 }
  0xda   : > { %v388_v53 = vpop.f32.mrf.mxu2 }
  0xdb   : > { %v389_v54 = vadd.f32 %v711_v40, %v388_v53  ;;  %v417_v55 = vpop.f32.mrf.mxu3 }
  0xdc   : > { %v381_v56 = vpop.f32.mrf.mxu0 }
  0xdd   : > { %v418_v57 = vadd.f32 %v417_v55, %v389_v54  ;;  %v382_v58 = vadd.f32 %v711_v40, %v381_v56  ;;  %v410_v59 = vpop.f32.mrf.mxu1 }
  0xdf   : > { %430 = vst [vmem:[%s999_s21 + $0x28] sm:$0xff] %v418_v57  ;;  %v411_v60 = vadd.f32 %v410_v59, %v382_v58 }
  0xe1   : > { %427 = vst [vmem:[%s999_s21 + $0x10] sm:$0xff] %v411_v60 }
  0xe2   : > { %v391_v61 = vpop.f32.mrf.mxu2 }
  0xe3   : > { %v392_v62 = vadd.f32 %v711_v40, %v391_v61  ;;  %v420_v63 = vpop.f32.mrf.mxu3 }
  0xe4   : > { %v383_v0 = vpop.f32.mrf.mxu0 }
  0xe5   : > { %v421_v1 = vadd.f32 %v420_v63, %v392_v62  ;;  %v384_v2 = vadd.f32 %v711_v40, %v383_v0  ;;  %v412_v3 = vpop.f32.mrf.mxu1 }
  0xe7   : > { %431 = vst [vmem:[%s999_s21 + $0x30] sm:$0xff] %v421_v1  ;;  %v413_v4 = vadd.f32 %v412_v3, %v384_v2 }
  0xe9   : > { %428 = vst [vmem:[%s999_s21 + $0x18] sm:$0xff] %v413_v4 }
  0xea   : > { %v393_v5 = vpop.f32.mrf.mxu2 }
  0xeb   : > { %v394_v6 = vadd.f32 %v711_v40, %v393_v5  ;;  %v422_v7 = vpop.f32.mrf.mxu3 }
  0xed   : > { %v423_v8 = vadd.f32 %v422_v7, %v394_v6 }
  0xef   : > { %432 = vst [vmem:[%s999_s21 + $0x38] sm:$0xff] %v423_v8 }
  0xf0   : > { %799 = shalt.err (!%p796_p10)
}
  0xf1   : > { %s849_s10 = smov 128   ;;  %s850_s18 = smov 8  }
  0xf2   : > { %654 = dma.vmem_to_hbm [thread:$0]  (%p937_p5), %s447_s29, 1024, %s449_s30, %s434_s16, %s849_s10, %s849_s10, %s850_s18  }
  0xf3 PF: > { %p671_p11 = scmp.ge.s32.totalorder %s842_s15, 2  ;;  %s463_s23 = sand.u32 1, %s830_s12  }
  0xf4   : > { %s464_s17 = scalar_lea.sflag [#allocation4], %s463_s23 }
  0xf5   : > { %p665_p12 = pnand %p671_p11, %p906_p6 }
  0xf7   : > { %p666_p13 = pneg %p665_p12 }
  0xf9   : > { %825 = dma.done.wait (%p666_p13), %s464_s17, 1024  }
  0xfa   : > { %827 = vsyncadd (%p666_p13), %s464_s17, 4294966272  ;;  %p17_p0 = scmp.ge.s32.totalorder %s923_s26, 6   ;;  %s1051_s12 = smov %s834_s13 }
  0xfb   : > { %s1052_s13 = smov %s838_s14  ;;  %s1053_s14 = smov %s933_s4 }
  0xfc   : > { %s1054_s15 = smov %s923_s26  ;;  %19 = sbr.rel (!%p17_p0) target bundleno = 6 (0x6), region = 81 }
 0x101   :  { %470 = vsyncpa [#allocation3], 1 }
 0x102   :  { %472 = vsyncpa [#allocation3 + $0x1], 1 }
 0x103   :  { %473 = vsyncpa [#allocation6], 1 }
 0x104   :  { %474 = vsyncpa [#allocation4], 1 }
 0x105   :  { %476 = vsyncpa [#allocation4 + $0x1], 1 }

</bundles_post_ra>
